<compile_context>
chip_gen: v6e
topology: v6e:2x2x1
jax: 0.10.0
libtpu: 0.0.40
codegen_flags: <defaults>
</compile_context>

<pallas_src>
import math

import jax
import jax.numpy as jnp
from jax import lax
from jax.experimental import pallas as pl
from jax.experimental.pallas import tpu as pltpu

_EPS = 1e-5


def _round_up(n, m):
    return ((n + m - 1) // m) * m


def _make_kernel(kernel_sizes, feature_nums, B, L, C):
    """Build the fused kernel body (everything runs in one pallas_call)."""
    n_branch = len(kernel_sizes)
    S = sum(feature_nums)
    Louts = [L - k + 1 for k in kernel_sizes]
    Lpads = [_round_up(lo, 8) for lo in Louts]          # sublane-aligned rows
    # Padded length of the shared x view so every tap slice has Lpad rows.
    Lx = max([L] + [k - 1 + lp for k, lp in zip(kernel_sizes, Lpads)])

    def kernel(x_ref, *refs):
        w_refs = refs[:n_branch]            # bf16 [w1 ; pad ; w2] slab / branch
        rw_ref = refs[n_branch]             # (C, S)  bf16 residual 1x1 weight
        small_ref = refs[n_branch + 1]      # (5, S)  f32: rb, g1, be1, g2, be2
        out_ref = refs[n_branch + 2]        # (B, S)

        xbf = x_ref[...].astype(jnp.bfloat16)            # (B*L, C), single cast

        # ---- residual 1x1 conv: ONE matmul + ONE reshaped max-reduction ----
        res = jnp.dot(xbf, rw_ref[...], preferred_element_type=jnp.float32)
        res_max = jnp.max(res.reshape(B, L, S), axis=1)  # (B, S)

        small = small_ref[...]                           # (5, S) f32
        rb = small[0:1, :]                               # (1, S)

        # Shared, length-padded 3-D view of x for tap slicing (value, no store).
        x3 = xbf.reshape(B, L, C)
        if Lx > L:
            x3 = jnp.concatenate(
                [x3, jnp.zeros((B, Lx - L, C), jnp.bfloat16)], axis=1)

        pooled_parts = []
        off = 0
        for bi, (k, F) in enumerate(zip(kernel_sizes, feature_nums)):
            Lout, Lpad = Louts[bi], Lpads[bi]
            kC = k * C
            kC_pad = _round_up(kC, 8)
            wref = w_refs[bi]
            w1 = wref[0:kC, :]                           # (kC, F) bf16
            w2 = wref[kC_pad:kC_pad + F, :]              # (F, F)  bf16 (aligned)

            g1 = small[1:2, off:off + F]
            be1 = small[2:3, off:off + F]
            g2 = small[3:4, off:off + F]
            be2 = small[4:5, off:off + F]

            # ---- im2col as a value: batches along rows, taps along lanes ----
            taps = [x3[:, j:j + Lpad, :] for j in range(k)]
            im2col = jnp.concatenate(taps, axis=2).reshape(B * Lpad, kC)

            # 0/1 row-validity mask (rows >= Lout within each batch are pad).
            if Lpad != Lout:
                row = lax.broadcasted_iota(jnp.int32, (B * Lpad, 1), 0)
                mask = ((row % Lpad) < Lout).astype(jnp.float32)
            else:
                mask = None

            def mmask(a):
                return a if mask is None else a * mask

            n_elem = float(B * Lout)
            inv_n = 1.0 / n_elem

            # ---- Conv1d(C->F, kernel=k): one MXU matmul (bias cancelled by BN)
            y = mmask(jnp.dot(im2col, w1, preferred_element_type=jnp.float32))

            # ---- BatchNorm1d (batch stats, one pass) + ReLU ----
            m1 = jnp.sum(y, axis=0, keepdims=True) * inv_n
            v1 = jnp.maximum(jnp.sum(y * y, axis=0, keepdims=True) * inv_n
                             - m1 * m1, 0.0)
            sc1 = lax.rsqrt(v1 + _EPS) * g1
            y = mmask(jnp.maximum(y * sc1 + (be1 - m1 * sc1), 0.0))

            # ---- Conv1d(F->F, kernel=1) ----
            z = jnp.dot(y.astype(jnp.bfloat16), w2,
                        preferred_element_type=jnp.float32)

            # ---- BatchNorm1d + ReLU (second block) ----
            m2 = jnp.sum(z, axis=0, keepdims=True) * inv_n
            v2 = jnp.maximum(jnp.sum(z * z, axis=0, keepdims=True) * inv_n
                             - m2 * m2, 0.0)
            sc2 = lax.rsqrt(v2 + _EPS) * g2
            z = mmask(jnp.maximum(z * sc2 + (be2 - m2 * sc2), 0.0))

            # ---- global max-pool over length: one reshaped reduction ----
            # pad rows are 0, valid rows are >= 0 (post-ReLU), so max is exact.
            pooled_parts.append(jnp.max(z.reshape(B, Lpad, F), axis=1))  # (B,F)
            off += F

        # ---- single coalesced output store: branches + residual + rb ----
        feat = jnp.concatenate(pooled_parts, axis=1)     # (B, S)
        out_ref[...] = (feat + res_max + rb).astype(out_ref.dtype)

    return kernel


def init_params(key, feature_kernel, input_size):
    """Deterministic synthetic parameters (PyTorch-like uniform init)."""
    kernel_sizes = list(feature_kernel.keys())
    feature_nums = [feature_kernel[k] for k in kernel_sizes]
    S = sum(feature_nums)
    params = []
    for k, F in zip(kernel_sizes, feature_nums):
        key, k1, k2, k3, k4 = jax.random.split(key, 5)
        bound1 = 1.0 / math.sqrt(input_size * k)
        w1 = jax.random.uniform(k1, (k, input_size, F), jnp.float32, -bound1, bound1)
        b1 = jax.random.uniform(k2, (1, F), jnp.float32, -bound1, bound1)
        g1 = jnp.ones((1, F), jnp.float32)
        be1 = jnp.zeros((1, F), jnp.float32)
        bound2 = 1.0 / math.sqrt(F)
        w2 = jax.random.uniform(k3, (F, F), jnp.float32, -bound2, bound2)
        b2 = jax.random.uniform(k4, (1, F), jnp.float32, -bound2, bound2)
        g2 = jnp.ones((1, F), jnp.float32)
        be2 = jnp.zeros((1, F), jnp.float32)
        params += [w1, b1, g1, be1, w2, b2, g2, be2]
    key, k1, k2 = jax.random.split(key, 3)
    boundr = 1.0 / math.sqrt(input_size)
    rw = jax.random.uniform(k1, (input_size, S), jnp.float32, -boundr, boundr)
    rb = jax.random.uniform(k2, (1, S), jnp.float32, -boundr, boundr)
    params += [rw, rb]
    return params


def cnn_extractor2_forward(x, params, feature_kernel):
    B, L, C = x.shape
    kernel_sizes = tuple(feature_kernel.keys())
    feature_nums = tuple(feature_kernel[k] for k in kernel_sizes)
    S = sum(feature_nums)

    x2d = x.reshape(B * L, C)

    # ---- host-side parameter packing: 4 inputs total (plus x) ----
    w_slabs = []
    small = jnp.zeros((5, S), jnp.float32)     # row0: rb; rows1-4: g1,be1,g2,be2
    off = 0
    for bi, (k, F) in enumerate(zip(kernel_sizes, feature_nums)):
        w1, b1, g1, be1, w2, b2, g2, be2 = params[bi * 8:bi * 8 + 8]
        # b1/b2 are dropped: training-mode BN batch statistics absorb them.
        kC = k * C
        kC_pad = _round_up(kC, 8)
        slab = jnp.zeros((kC_pad + F, F), jnp.float32)
        slab = slab.at[0:kC, :].set(w1.reshape(kC, F))
        slab = slab.at[kC_pad:kC_pad + F, :].set(w2)
        w_slabs.append(slab.astype(jnp.bfloat16))
        small = small.at[1:2, off:off + F].set(g1)
        small = small.at[2:3, off:off + F].set(be1)
        small = small.at[3:4, off:off + F].set(g2)
        small = small.at[4:5, off:off + F].set(be2)
        off += F
    rw, rb = params[-2], params[-1]
    small = small.at[0:1, :].set(rb)
    rw_bf = rw.astype(jnp.bfloat16)

    kernel = _make_kernel(kernel_sizes, feature_nums, B, L, C)
    vmem = pl.BlockSpec(memory_space=pltpu.MemorySpace.VMEM)
    return pl.pallas_call(
        kernel,
        out_shape=jax.ShapeDtypeStruct((B, S), x.dtype),
        in_specs=[vmem] * (1 + len(w_slabs) + 2),
        out_specs=vmem,
    )(x2d, *w_slabs, rw_bf, small)


# ---------------- plain-JAX f32 reference (numerical sanity check) ----------
def _bn_relu_ref(y, g, b):
    mean = jnp.mean(y, axis=(0, 1), keepdims=True)
    var = jnp.mean((y - mean) ** 2, axis=(0, 1), keepdims=True)
    return jnp.maximum((y - mean) * lax.rsqrt(var + _EPS)
                       * g.reshape(1, 1, -1) + b.reshape(1, 1, -1), 0.0)


def reference(x, params, feature_kernel):
    B, L, C = x.shape
    kernel_sizes = list(feature_kernel.keys())
    feature_nums = [feature_kernel[k] for k in kernel_sizes]
    feats = []
    pi = 0
    for k, F in zip(kernel_sizes, feature_nums):
        w1, b1, g1, be1, w2, b2, g2, be2 = params[pi:pi + 8]
        pi += 8
        Lout = L - k + 1
        y = jnp.zeros((B, Lout, F), jnp.float32)
        for j in range(k):
            y = y + jnp.einsum('blc,cf->blf', x[:, j:j + Lout, :], w1[j])
        y = _bn_relu_ref(y + b1.reshape(1, 1, F), g1, be1)
        z = jnp.einsum('blf,fg->blg', y, w2) + b2.reshape(1, 1, F)
        z = _bn_relu_ref(z, g2, be2)
        feats.append(jnp.max(z, axis=1))
    rw, rb = params[pi], params[pi + 1]
    res = jnp.einsum('blc,cs->bls', x, rw) + rb.reshape(1, 1, -1)
    res = jnp.max(res, axis=1)
    return jnp.concatenate(feats, axis=-1) + res


if __name__ == "__main__":
    feature_kernel = {3: 16, 5: 32}   # kernel_size -> feature_num
    B, L, C = 2, 16, 8                # batch, seq_len, input_size

    key = jax.random.PRNGKey(0)
    kx, kp = jax.random.split(key)
    x = jax.random.normal(kx, (B, L, C), jnp.float32)
    params = init_params(kp, feature_kernel, C)

    out = cnn_extractor2_forward(x, params, feature_kernel)
    out = jax.block_until_ready(out)

    ref = reference(x, params, feature_kernel)
    assert out.shape == (B, sum(feature_kernel.values())), out.shape
    # Tolerance covers bf16 MXU operands (accumulation and BN stats are f32).
    assert jnp.allclose(out, ref, atol=5e-2, rtol=5e-2), (
        f"max abs diff {float(jnp.max(jnp.abs(out - ref)))}")

    print("KERNEL_OK")
</pallas_src>

<mosaic_0001>
module attributes {stable_mosaic.version = 11 : i64} {
  func.func @kernel(%arg0: memref<32x8xf32, #tpu.memory_space<vmem>>, %arg1: memref<40x16xbf16, #tpu.memory_space<vmem>>, %arg2: memref<72x32xbf16, #tpu.memory_space<vmem>>, %arg3: memref<8x48xbf16, #tpu.memory_space<vmem>>, %arg4: memref<5x48xf32, #tpu.memory_space<vmem>>, %arg5: memref<2x48xf32, #tpu.memory_space<vmem>>) attributes {dimension_semantics = [], scalar_prefetch = 0 : i64, scratch_operands = 0 : i64, tpu.core_type = #tpu.core_type<tc>} {
    %c0 = arith.constant 0 : index
    %c0_0 = arith.constant 0 : index
    %0 = vector.load %arg0[%c0, %c0_0] : memref<32x8xf32, #tpu.memory_space<vmem>>, vector<32x8xf32>
    %1 = arith.truncf %0 : vector<32x8xf32> to vector<32x8xbf16>
    %c0_1 = arith.constant 0 : index
    %c0_2 = arith.constant 0 : index
    %2 = vector.load %arg3[%c0_1, %c0_2] : memref<8x48xbf16, #tpu.memory_space<vmem>>, vector<8x48xbf16>
    %cst = arith.constant dense<0.000000e+00> : vector<32x48xf32>
    %3 = tpu.matmul %1, %2, %cst {dimension_numbers = #tpu.dot_dimension_numbers<[1], [0], [0], [1], [0, 0, 1, 1], [], []>} : vector<32x8xbf16>, vector<8x48xbf16>, vector<32x48xf32> -> vector<32x48xf32>
    %4 = vector.shape_cast %3 : vector<32x48xf32> to vector<2x16x48xf32>
    %cst_3 = arith.constant dense<0xFF800000> : vector<2x48xf32>
    %5 = vector.multi_reduction <maximumf>, %4, %cst_3 [1] : vector<2x16x48xf32> to vector<2x48xf32>
    %c0_4 = arith.constant 0 : index
    %c0_5 = arith.constant 0 : index
    %6 = vector.load %arg4[%c0_4, %c0_5] : memref<5x48xf32, #tpu.memory_space<vmem>>, vector<5x48xf32>
    %7 = vector.extract_strided_slice %6 {offsets = [0, 0], sizes = [1, 48], strides = [1, 1]} : vector<5x48xf32> to vector<1x48xf32>
    %8 = vector.shape_cast %1 : vector<32x8xbf16> to vector<2x16x8xbf16>
    %cst_6 = arith.constant 0.000000e+00 : bf16
    %9 = vector.broadcast %cst_6 : bf16 to vector<2x4x8xbf16>
    %10 = tpu.concatenate %8, %9 in 1 : vector<2x16x8xbf16>, vector<2x4x8xbf16> -> vector<2x20x8xbf16>
    %c0_7 = arith.constant 0 : index
    %c0_8 = arith.constant 0 : index
    %11 = vector.load %arg1[%c0_7, %c0_8] : memref<40x16xbf16, #tpu.memory_space<vmem>>, vector<24x16xbf16>
    %c24 = arith.constant 24 : index
    %c0_9 = arith.constant 0 : index
    %12 = vector.load %arg1[%c24, %c0_9] : memref<40x16xbf16, #tpu.memory_space<vmem>>, vector<16x16xbf16>
    %13 = vector.extract_strided_slice %6 {offsets = [1, 0], sizes = [1, 16], strides = [1, 1]} : vector<5x48xf32> to vector<1x16xf32>
    %14 = vector.extract_strided_slice %6 {offsets = [2, 0], sizes = [1, 16], strides = [1, 1]} : vector<5x48xf32> to vector<1x16xf32>
    %15 = vector.extract_strided_slice %6 {offsets = [3, 0], sizes = [1, 16], strides = [1, 1]} : vector<5x48xf32> to vector<1x16xf32>
    %16 = vector.extract_strided_slice %6 {offsets = [4, 0], sizes = [1, 16], strides = [1, 1]} : vector<5x48xf32> to vector<1x16xf32>
    %17 = vector.extract_strided_slice %10 {offsets = [0, 0, 0], sizes = [2, 16, 8], strides = [1, 1, 1]} : vector<2x20x8xbf16> to vector<2x16x8xbf16>
    %18 = vector.extract_strided_slice %10 {offsets = [0, 1, 0], sizes = [2, 16, 8], strides = [1, 1, 1]} : vector<2x20x8xbf16> to vector<2x16x8xbf16>
    %19 = vector.extract_strided_slice %10 {offsets = [0, 2, 0], sizes = [2, 16, 8], strides = [1, 1, 1]} : vector<2x20x8xbf16> to vector<2x16x8xbf16>
    %20 = tpu.concatenate %17, %18, %19 in 2 : vector<2x16x8xbf16>, vector<2x16x8xbf16>, vector<2x16x8xbf16> -> vector<2x16x24xbf16>
    %21 = vector.shape_cast %20 : vector<2x16x24xbf16> to vector<32x24xbf16>
    %22 = tpu.iota {dimensions = array<i32: 0>} : vector<32x1xi32>
    %c16_i32 = arith.constant 16 : i32
    %c0_i32 = arith.constant 0 : i32
    %23 = arith.cmpi eq, %c16_i32, %c0_i32 : i32
    %c1_i32 = arith.constant 1 : i32
    %24 = arith.select %23, %c1_i32, %c16_i32 : i32
    %25 = vector.broadcast %24 : i32 to vector<32x1xi32>
    %26 = arith.remsi %22, %25 : vector<32x1xi32>
    %c0_i32_10 = arith.constant 0 : i32
    %27 = vector.broadcast %c0_i32_10 : i32 to vector<32x1xi32>
    %28 = arith.cmpi ne, %26, %27 : vector<32x1xi32>
    %c0_i32_11 = arith.constant 0 : i32
    %29 = vector.broadcast %c0_i32_11 : i32 to vector<32x1xi32>
    %30 = arith.cmpi slt, %26, %29 : vector<32x1xi32>
    %c0_i32_12 = arith.constant 0 : i32
    %31 = arith.cmpi slt, %24, %c0_i32_12 : i32
    %32 = vector.broadcast %31 : i1 to vector<32x1xi1>
    %33 = vector.broadcast %32 : vector<32x1xi1> to vector<32x1xi1>
    %34 = arith.xori %30, %33 : vector<32x1xi1>
    %35 = arith.andi %34, %28 : vector<32x1xi1>
    %36 = vector.broadcast %24 : i32 to vector<32x1xi32>
    %37 = arith.addi %26, %36 : vector<32x1xi32>
    %38 = arith.select %35, %37, %26 : vector<32x1xi1>, vector<32x1xi32>
    %c14_i32 = arith.constant 14 : i32
    %39 = vector.broadcast %c14_i32 : i32 to vector<32x1xi32>
    %40 = arith.cmpi slt, %38, %39 : vector<32x1xi32>
    %41 = arith.extui %40 : vector<32x1xi1> to vector<32x1xi32>
    %42 = arith.sitofp %41 : vector<32x1xi32> to vector<32x1xf32>
    %cst_13 = arith.constant dense<0.000000e+00> : vector<32x16xf32>
    %43 = tpu.matmul %21, %11, %cst_13 {dimension_numbers = #tpu.dot_dimension_numbers<[1], [0], [0], [1], [0, 0, 1, 1], [], []>} : vector<32x24xbf16>, vector<24x16xbf16>, vector<32x16xf32> -> vector<32x16xf32>
    %44 = vector.broadcast %42 : vector<32x1xf32> to vector<32x16xf32>
    %45 = arith.mulf %43, %44 : vector<32x16xf32>
    %cst_14 = arith.constant dense<0.000000e+00> : vector<16xf32>
    %46 = vector.multi_reduction <add>, %45, %cst_14 [0] : vector<32x16xf32> to vector<16xf32>
    %47 = vector.shape_cast %46 : vector<16xf32> to vector<1x16xf32>
    %cst_15 = arith.constant 0.0357142873 : f32
    %48 = vector.broadcast %cst_15 : f32 to vector<1x16xf32>
    %49 = arith.mulf %47, %48 : vector<1x16xf32>
    %50 = arith.mulf %45, %45 : vector<32x16xf32>
    %cst_16 = arith.constant dense<0.000000e+00> : vector<16xf32>
    %51 = vector.multi_reduction <add>, %50, %cst_16 [0] : vector<32x16xf32> to vector<16xf32>
    %52 = vector.shape_cast %51 : vector<16xf32> to vector<1x16xf32>
    %cst_17 = arith.constant 0.0357142873 : f32
    %53 = vector.broadcast %cst_17 : f32 to vector<1x16xf32>
    %54 = arith.mulf %52, %53 : vector<1x16xf32>
    %55 = arith.mulf %49, %49 : vector<1x16xf32>
    %56 = arith.subf %54, %55 : vector<1x16xf32>
    %cst_18 = arith.constant 0.000000e+00 : f32
    %57 = vector.broadcast %cst_18 : f32 to vector<1x16xf32>
    %58 = arith.maximumf %56, %57 : vector<1x16xf32>
    %cst_19 = arith.constant 9.99999974E-6 : f32
    %59 = vector.broadcast %cst_19 : f32 to vector<1x16xf32>
    %60 = arith.addf %58, %59 : vector<1x16xf32>
    %61 = math.rsqrt %60 : vector<1x16xf32>
    %62 = arith.mulf %61, %13 : vector<1x16xf32>
    %63 = vector.broadcast %62 : vector<1x16xf32> to vector<32x16xf32>
    %64 = arith.mulf %45, %63 : vector<32x16xf32>
    %65 = arith.mulf %49, %62 : vector<1x16xf32>
    %66 = arith.subf %14, %65 : vector<1x16xf32>
    %67 = vector.broadcast %66 : vector<1x16xf32> to vector<32x16xf32>
    %68 = arith.addf %64, %67 : vector<32x16xf32>
    %cst_20 = arith.constant 0.000000e+00 : f32
    %69 = vector.broadcast %cst_20 : f32 to vector<32x16xf32>
    %70 = arith.maximumf %68, %69 : vector<32x16xf32>
    %71 = vector.broadcast %42 : vector<32x1xf32> to vector<32x16xf32>
    %72 = arith.mulf %70, %71 : vector<32x16xf32>
    %73 = arith.truncf %72 : vector<32x16xf32> to vector<32x16xbf16>
    %cst_21 = arith.constant dense<0.000000e+00> : vector<32x16xf32>
    %74 = tpu.matmul %73, %12, %cst_21 {dimension_numbers = #tpu.dot_dimension_numbers<[1], [0], [0], [1], [0, 0, 1, 1], [], []>} : vector<32x16xbf16>, vector<16x16xbf16>, vector<32x16xf32> -> vector<32x16xf32>
    %cst_22 = arith.constant dense<0.000000e+00> : vector<16xf32>
    %75 = vector.multi_reduction <add>, %74, %cst_22 [0] : vector<32x16xf32> to vector<16xf32>
    %76 = vector.shape_cast %75 : vector<16xf32> to vector<1x16xf32>
    %cst_23 = arith.constant 0.0357142873 : f32
    %77 = vector.broadcast %cst_23 : f32 to vector<1x16xf32>
    %78 = arith.mulf %76, %77 : vector<1x16xf32>
    %79 = arith.mulf %74, %74 : vector<32x16xf32>
    %cst_24 = arith.constant dense<0.000000e+00> : vector<16xf32>
    %80 = vector.multi_reduction <add>, %79, %cst_24 [0] : vector<32x16xf32> to vector<16xf32>
    %81 = vector.shape_cast %80 : vector<16xf32> to vector<1x16xf32>
    %cst_25 = arith.constant 0.0357142873 : f32
    %82 = vector.broadcast %cst_25 : f32 to vector<1x16xf32>
    %83 = arith.mulf %81, %82 : vector<1x16xf32>
    %84 = arith.mulf %78, %78 : vector<1x16xf32>
    %85 = arith.subf %83, %84 : vector<1x16xf32>
    %cst_26 = arith.constant 0.000000e+00 : f32
    %86 = vector.broadcast %cst_26 : f32 to vector<1x16xf32>
    %87 = arith.maximumf %85, %86 : vector<1x16xf32>
    %cst_27 = arith.constant 9.99999974E-6 : f32
    %88 = vector.broadcast %cst_27 : f32 to vector<1x16xf32>
    %89 = arith.addf %87, %88 : vector<1x16xf32>
    %90 = math.rsqrt %89 : vector<1x16xf32>
    %91 = arith.mulf %90, %15 : vector<1x16xf32>
    %92 = vector.broadcast %91 : vector<1x16xf32> to vector<32x16xf32>
    %93 = arith.mulf %74, %92 : vector<32x16xf32>
    %94 = arith.mulf %78, %91 : vector<1x16xf32>
    %95 = arith.subf %16, %94 : vector<1x16xf32>
    %96 = vector.broadcast %95 : vector<1x16xf32> to vector<32x16xf32>
    %97 = arith.addf %93, %96 : vector<32x16xf32>
    %cst_28 = arith.constant 0.000000e+00 : f32
    %98 = vector.broadcast %cst_28 : f32 to vector<32x16xf32>
    %99 = arith.maximumf %97, %98 : vector<32x16xf32>
    %100 = vector.broadcast %42 : vector<32x1xf32> to vector<32x16xf32>
    %101 = arith.mulf %99, %100 : vector<32x16xf32>
    %102 = vector.shape_cast %101 : vector<32x16xf32> to vector<2x16x16xf32>
    %cst_29 = arith.constant dense<0xFF800000> : vector<2x16xf32>
    %103 = vector.multi_reduction <maximumf>, %102, %cst_29 [1] : vector<2x16x16xf32> to vector<2x16xf32>
    %c0_30 = arith.constant 0 : index
    %c0_31 = arith.constant 0 : index
    %104 = vector.load %arg2[%c0_30, %c0_31] : memref<72x32xbf16, #tpu.memory_space<vmem>>, vector<40x32xbf16>
    %c40 = arith.constant 40 : index
    %c0_32 = arith.constant 0 : index
    %105 = vector.load %arg2[%c40, %c0_32] : memref<72x32xbf16, #tpu.memory_space<vmem>>, vector<32x32xbf16>
    %106 = vector.extract_strided_slice %6 {offsets = [1, 16], sizes = [1, 32], strides = [1, 1]} : vector<5x48xf32> to vector<1x32xf32>
    %107 = vector.extract_strided_slice %6 {offsets = [2, 16], sizes = [1, 32], strides = [1, 1]} : vector<5x48xf32> to vector<1x32xf32>
    %108 = vector.extract_strided_slice %6 {offsets = [3, 16], sizes = [1, 32], strides = [1, 1]} : vector<5x48xf32> to vector<1x32xf32>
    %109 = vector.extract_strided_slice %6 {offsets = [4, 16], sizes = [1, 32], strides = [1, 1]} : vector<5x48xf32> to vector<1x32xf32>
    %110 = vector.extract_strided_slice %10 {offsets = [0, 0, 0], sizes = [2, 16, 8], strides = [1, 1, 1]} : vector<2x20x8xbf16> to vector<2x16x8xbf16>
    %111 = vector.extract_strided_slice %10 {offsets = [0, 1, 0], sizes = [2, 16, 8], strides = [1, 1, 1]} : vector<2x20x8xbf16> to vector<2x16x8xbf16>
    %112 = vector.extract_strided_slice %10 {offsets = [0, 2, 0], sizes = [2, 16, 8], strides = [1, 1, 1]} : vector<2x20x8xbf16> to vector<2x16x8xbf16>
    %113 = vector.extract_strided_slice %10 {offsets = [0, 3, 0], sizes = [2, 16, 8], strides = [1, 1, 1]} : vector<2x20x8xbf16> to vector<2x16x8xbf16>
    %114 = vector.extract_strided_slice %10 {offsets = [0, 4, 0], sizes = [2, 16, 8], strides = [1, 1, 1]} : vector<2x20x8xbf16> to vector<2x16x8xbf16>
    %115 = tpu.concatenate %110, %111, %112, %113, %114 in 2 : vector<2x16x8xbf16>, vector<2x16x8xbf16>, vector<2x16x8xbf16>, vector<2x16x8xbf16>, vector<2x16x8xbf16> -> vector<2x16x40xbf16>
    %116 = vector.shape_cast %115 : vector<2x16x40xbf16> to vector<32x40xbf16>
    %117 = tpu.iota {dimensions = array<i32: 0>} : vector<32x1xi32>
    %c16_i32_33 = arith.constant 16 : i32
    %c0_i32_34 = arith.constant 0 : i32
    %118 = arith.cmpi eq, %c16_i32_33, %c0_i32_34 : i32
    %c1_i32_35 = arith.constant 1 : i32
    %119 = arith.select %118, %c1_i32_35, %c16_i32_33 : i32
    %120 = vector.broadcast %119 : i32 to vector<32x1xi32>
    %121 = arith.remsi %117, %120 : vector<32x1xi32>
    %c0_i32_36 = arith.constant 0 : i32
    %122 = vector.broadcast %c0_i32_36 : i32 to vector<32x1xi32>
    %123 = arith.cmpi ne, %121, %122 : vector<32x1xi32>
    %c0_i32_37 = arith.constant 0 : i32
    %124 = vector.broadcast %c0_i32_37 : i32 to vector<32x1xi32>
    %125 = arith.cmpi slt, %121, %124 : vector<32x1xi32>
    %c0_i32_38 = arith.constant 0 : i32
    %126 = arith.cmpi slt, %119, %c0_i32_38 : i32
    %127 = vector.broadcast %126 : i1 to vector<32x1xi1>
    %128 = vector.broadcast %127 : vector<32x1xi1> to vector<32x1xi1>
    %129 = arith.xori %125, %128 : vector<32x1xi1>
    %130 = arith.andi %129, %123 : vector<32x1xi1>
    %131 = vector.broadcast %119 : i32 to vector<32x1xi32>
    %132 = arith.addi %121, %131 : vector<32x1xi32>
    %133 = arith.select %130, %132, %121 : vector<32x1xi1>, vector<32x1xi32>
    %c12_i32 = arith.constant 12 : i32
    %134 = vector.broadcast %c12_i32 : i32 to vector<32x1xi32>
    %135 = arith.cmpi slt, %133, %134 : vector<32x1xi32>
    %136 = arith.extui %135 : vector<32x1xi1> to vector<32x1xi32>
    %137 = arith.sitofp %136 : vector<32x1xi32> to vector<32x1xf32>
    %cst_39 = arith.constant dense<0.000000e+00> : vector<32x32xf32>
    %138 = tpu.matmul %116, %104, %cst_39 {dimension_numbers = #tpu.dot_dimension_numbers<[1], [0], [0], [1], [0, 0, 1, 1], [], []>} : vector<32x40xbf16>, vector<40x32xbf16>, vector<32x32xf32> -> vector<32x32xf32>
    %139 = vector.broadcast %137 : vector<32x1xf32> to vector<32x32xf32>
    %140 = arith.mulf %138, %139 : vector<32x32xf32>
    %cst_40 = arith.constant dense<0.000000e+00> : vector<32xf32>
    %141 = vector.multi_reduction <add>, %140, %cst_40 [0] : vector<32x32xf32> to vector<32xf32>
    %142 = vector.shape_cast %141 : vector<32xf32> to vector<1x32xf32>
    %cst_41 = arith.constant 0.0416666679 : f32
    %143 = vector.broadcast %cst_41 : f32 to vector<1x32xf32>
    %144 = arith.mulf %142, %143 : vector<1x32xf32>
    %145 = arith.mulf %140, %140 : vector<32x32xf32>
    %cst_42 = arith.constant dense<0.000000e+00> : vector<32xf32>
    %146 = vector.multi_reduction <add>, %145, %cst_42 [0] : vector<32x32xf32> to vector<32xf32>
    %147 = vector.shape_cast %146 : vector<32xf32> to vector<1x32xf32>
    %cst_43 = arith.constant 0.0416666679 : f32
    %148 = vector.broadcast %cst_43 : f32 to vector<1x32xf32>
    %149 = arith.mulf %147, %148 : vector<1x32xf32>
    %150 = arith.mulf %144, %144 : vector<1x32xf32>
    %151 = arith.subf %149, %150 : vector<1x32xf32>
    %cst_44 = arith.constant 0.000000e+00 : f32
    %152 = vector.broadcast %cst_44 : f32 to vector<1x32xf32>
    %153 = arith.maximumf %151, %152 : vector<1x32xf32>
    %cst_45 = arith.constant 9.99999974E-6 : f32
    %154 = vector.broadcast %cst_45 : f32 to vector<1x32xf32>
    %155 = arith.addf %153, %154 : vector<1x32xf32>
    %156 = math.rsqrt %155 : vector<1x32xf32>
    %157 = arith.mulf %156, %106 : vector<1x32xf32>
    %158 = vector.broadcast %157 : vector<1x32xf32> to vector<32x32xf32>
    %159 = arith.mulf %140, %158 : vector<32x32xf32>
    %160 = arith.mulf %144, %157 : vector<1x32xf32>
    %161 = arith.subf %107, %160 : vector<1x32xf32>
    %162 = vector.broadcast %161 : vector<1x32xf32> to vector<32x32xf32>
    %163 = arith.addf %159, %162 : vector<32x32xf32>
    %cst_46 = arith.constant 0.000000e+00 : f32
    %164 = vector.broadcast %cst_46 : f32 to vector<32x32xf32>
    %165 = arith.maximumf %163, %164 : vector<32x32xf32>
    %166 = vector.broadcast %137 : vector<32x1xf32> to vector<32x32xf32>
    %167 = arith.mulf %165, %166 : vector<32x32xf32>
    %168 = arith.truncf %167 : vector<32x32xf32> to vector<32x32xbf16>
    %cst_47 = arith.constant dense<0.000000e+00> : vector<32x32xf32>
    %169 = tpu.matmul %168, %105, %cst_47 {dimension_numbers = #tpu.dot_dimension_numbers<[1], [0], [0], [1], [0, 0, 1, 1], [], []>} : vector<32x32xbf16>, vector<32x32xbf16>, vector<32x32xf32> -> vector<32x32xf32>
    %cst_48 = arith.constant dense<0.000000e+00> : vector<32xf32>
    %170 = vector.multi_reduction <add>, %169, %cst_48 [0] : vector<32x32xf32> to vector<32xf32>
    %171 = vector.shape_cast %170 : vector<32xf32> to vector<1x32xf32>
    %cst_49 = arith.constant 0.0416666679 : f32
    %172 = vector.broadcast %cst_49 : f32 to vector<1x32xf32>
    %173 = arith.mulf %171, %172 : vector<1x32xf32>
    %174 = arith.mulf %169, %169 : vector<32x32xf32>
    %cst_50 = arith.constant dense<0.000000e+00> : vector<32xf32>
    %175 = vector.multi_reduction <add>, %174, %cst_50 [0] : vector<32x32xf32> to vector<32xf32>
    %176 = vector.shape_cast %175 : vector<32xf32> to vector<1x32xf32>
    %cst_51 = arith.constant 0.0416666679 : f32
    %177 = vector.broadcast %cst_51 : f32 to vector<1x32xf32>
    %178 = arith.mulf %176, %177 : vector<1x32xf32>
    %179 = arith.mulf %173, %173 : vector<1x32xf32>
    %180 = arith.subf %178, %179 : vector<1x32xf32>
    %cst_52 = arith.constant 0.000000e+00 : f32
    %181 = vector.broadcast %cst_52 : f32 to vector<1x32xf32>
    %182 = arith.maximumf %180, %181 : vector<1x32xf32>
    %cst_53 = arith.constant 9.99999974E-6 : f32
    %183 = vector.broadcast %cst_53 : f32 to vector<1x32xf32>
    %184 = arith.addf %182, %183 : vector<1x32xf32>
    %185 = math.rsqrt %184 : vector<1x32xf32>
    %186 = arith.mulf %185, %108 : vector<1x32xf32>
    %187 = vector.broadcast %186 : vector<1x32xf32> to vector<32x32xf32>
    %188 = arith.mulf %169, %187 : vector<32x32xf32>
    %189 = arith.mulf %173, %186 : vector<1x32xf32>
    %190 = arith.subf %109, %189 : vector<1x32xf32>
    %191 = vector.broadcast %190 : vector<1x32xf32> to vector<32x32xf32>
    %192 = arith.addf %188, %191 : vector<32x32xf32>
    %cst_54 = arith.constant 0.000000e+00 : f32
    %193 = vector.broadcast %cst_54 : f32 to vector<32x32xf32>
    %194 = arith.maximumf %192, %193 : vector<32x32xf32>
    %195 = vector.broadcast %137 : vector<32x1xf32> to vector<32x32xf32>
    %196 = arith.mulf %194, %195 : vector<32x32xf32>
    %197 = vector.shape_cast %196 : vector<32x32xf32> to vector<2x16x32xf32>
    %cst_55 = arith.constant dense<0xFF800000> : vector<2x32xf32>
    %198 = vector.multi_reduction <maximumf>, %197, %cst_55 [1] : vector<2x16x32xf32> to vector<2x32xf32>
    %199 = tpu.concatenate %103, %198 in 1 : vector<2x16xf32>, vector<2x32xf32> -> vector<2x48xf32>
    %200 = arith.addf %199, %5 : vector<2x48xf32>
    %201 = vector.broadcast %7 : vector<1x48xf32> to vector<2x48xf32>
    %202 = arith.addf %200, %201 : vector<2x48xf32>
    %c0_56 = arith.constant 0 : index
    %c0_57 = arith.constant 0 : index
    %203 = vector.load %arg5[%c0_56, %c0_57] : memref<2x48xf32, #tpu.memory_space<vmem>>, vector<2x48xf32>
    tpu.vector_store %arg5[%c0_56, %c0_57], %202 {strides = array<i32>} : memref<2x48xf32, #tpu.memory_space<vmem>>, vector<2x48xf32>,
    return
  }
}

</mosaic_0001>

<bundles_post_ra>
// kernel: tpu_custom_call.1
= control target key start
LH: loop header
LB: loop body
LE: loop exit
PB: predicated region body
PF: predicated region fallthrough
CT: control target
= control target key end

     0   :  { %v1051_v4 = vmov 0   ;;  %vm140_vm0 = vcmask 1046528   ;;  %vm114_vm1 = vsmask.f32 7424  ;;  %vm36_vm2 = vcmask 1043456   ;;  %s1052_s27 = smov 16   ;;  %s1368_s0 = inlined_call_operand.vmem [shape: f32[32,8], index: 0, kind: input, shape index: {}]   ;;  %s1369_s1 = inlined_call_operand.vmem [shape: bf16[40,16], index: 1, kind: input, shape index: {}]   ;;  %s1370_s2 = inlined_call_operand.vmem [shape: bf16[72,32], index: 2, kind: input, shape index: {}]   ;;  %s1371_s3 = inlined_call_operand.vmem [shape: bf16[8,48], index: 3, kind: input, shape index: {}]   ;;  %s1372_s4 = inlined_call_operand.vmem [shape: f32[5,48], index: 4, kind: input, shape index: {}]   ;;  %s1373_s5 = inlined_call_operand.hbm [shape: f32[2,48], index: 5, kind: output, shape index: {}]  }
   0x1   :  { %v22_v0 = vld [vmem:[%s1368_s0] sm:$0xff]  ;;  %v23_v1 = vld [vmem:[%s1368_s0 + $0x8] sm:$0xff]  ;;  %v24_v2 = vld [vmem:[%s1368_s0 + $0x10] sm:$0xff]  ;;  %v124_v5 = vrot.slane %v1051_v4, 1  ;;  %v525_v8 = vrot.slane %v1051_v4, 2  ;;  %vm29_vm4 = vcmask 64512  }
   0x2   :  { %v1098_v3 = vpack.c.bf16 %v23_v1, %v22_v0  ;;  %v25_v6 = vld [vmem:[%s1368_s0 + $0x18] sm:$0xff]  ;;  %v1013_v15 = vld [vmem:[%s1369_s1 + $0x8] ss:$0 sps:$4 sm:$0xff]   ;;  %vm518_vm3 = vsmask.f32 6400  ;;  %v1014_v26 = vld [vmem:[%s1369_s1] sm:$0xff]  }
   0x3   :  { %v1103_v7 = vpack.c.bf16 %v25_v6, %v24_v2  ;;  %v526_v18 = vor.u32 %v525_v8, %v124_v5  ;;  %1003 = vmatprep.subr.msk.bf16.mxu1 %vm36_vm2, %v1013_v15  ;;  %v239_v29 = vsel %vm36_vm2, %v1013_v15, 0  ;;  %s1053_s30 = smov 8   ;;  %vm536_vm5 = vcmask 1045504   ;;  %v1015_v35 = vld [vmem:[%s1370_s2 + $0x10] ss:$0 sps:$4 sm:$0xff]  }
   0x4   :  { %v141_v9 = vrot.slane %v1098_v3, 1  ;;  %v115_v10 = vshrl.u32 %v1098_v3, 16  ;;  %v117_v11 = vshll.u32 %v1098_v3, 16  ;;  %971 = vmatpush3.bf16.msra.mxu1 %v239_v29  ;;  %966 = vmatprep.mubr.msk.bf16.mxu0 %vm29_vm4, %v1098_v3 }
   0x5   :  { %v144_v12 = vrot.slane %v1103_v7, 1  ;;  %v126_v13 = vshrl.u32 %v1103_v7, 16  ;;  %v128_v14 = vshll.u32 %v1103_v7, 16  ;;  %v540_v31 = vrot.slane %v1103_v7, 2  ;;  %972 = vmatprep.subr.bf16.mxu1 %v1014_v26 }
   0x6   :  { %v143_v16 = vsel %vm140_vm0, %v141_v9, %v124_v5  ;;  %v119_v17 = vrot.slane %v117_v11, 1  ;;  %v519_v24 = vrot.slane %v115_v10, 1  ;;  %v520_v25 = vrot.slane %v117_v11, 2 }
   0x7   :  { %146 = vrot.lane.b32.xlu1 %v143_v16, %s1052_s27  ;;  %v528_v19 = vrot.slane %v126_v13, 1  ;;  %v529_v20 = vrot.slane %v128_v14, 2  ;;  %v130_v21 = vrot.slane %v128_v14, 1  ;;  %v145_v22 = vsel %vm140_vm0, %v144_v12, %v124_v5 }
   0x8   :  { %v120_v23 = vor.u32 %v119_v17, %v115_v10  ;;  %v521_v34 = vor.u32 %v520_v25, %v519_v24 }
   0x9   :  { %v530_v27 = vor.u32 %v529_v20, %v528_v19  ;;  %v131_v28 = vor.u32 %v130_v21, %v126_v13 }
   0xa   :  { %v125_v30 = vsel %vm114_vm1, %v120_v23, %v124_v5 }
   0xb   :  { %148 = vrot.lane.b32.xlu1 %v145_v22, %s1052_s27  ;;  %133 = vrot.lane.b32.xlu0 %v125_v30, %s1053_s30  ;;  %v531_v32 = vsel %vm518_vm3, %v530_v27, %v526_v18  ;;  %v132_v33 = vsel %vm114_vm1, %v131_v28, %v124_v5 }
   0xc   :  { %10 = vsyncpa [#allocation3], 0  ;;  %973 = vmatpush3.bf16.msra.mxu1 %v1014_v26  ;;  %s1054_s8 = smov 24   ;;  %v541_v36 = vsel %vm536_vm5, %v540_v31, %v525_v8  ;;  %v527_v37 = vsel %vm518_vm3, %v521_v34, %v526_v18  ;;  %v537_v38 = vrot.slane %v1098_v3, 2  ;;  %s1055_s9 = smov 32   ;;  %vm154_vm6 = vcmask 130048  }
   0xd   :  { %1004 = vmatprep.subr.msk.bf16.mxu1 %vm36_vm2, %v1015_v35  ;;  %v1140_v40 = vld [vmem:[%s1372_s4] sm:$0x1f]  ;;  %s1056_s12 = smov 112   ;;  %vm233_vm7 = vcmask 195584   ;;  %v588_v49 = vsel %vm36_vm2, %v1015_v35, 0  ;;  %v1016_v50 = vld [vmem:[%s1370_s2 + $0x8] sm:$0xff]   ;;  %v159_v0 = vlaneseq }
   0xe   :  { %v539_v39 = vsel %vm536_vm5, %v537_v38, %v525_v8  ;;  %v681_v41 = vrot.slane %v1140_v40, 1  ;;  %v1017_v54 = vld [vmem:[%s1370_s2] sm:$0xff]   ;;  %vm582_vm8 = vcmask 326656   ;;  %vm550_vm9 = vcmask 261120   ;;  %v1018_v63 = vld [vmem:[%s1369_s1 + $0xc] sm:$0xff]  }
   0xf   :  { %534 = vrot.lane.b32.xlu1 %v531_v32, %s1054_s8  ;;  %135 = vrot.lane.b32.xlu0 %v132_v33, %s1053_s30  ;;  %v28_v61 = vld [vmem:[%s1371_s3] sm:$0xf]  ;;  %v1173_v1 = vshrl.u32 %v159_v0, 7  ;;  %v1057_v8 = vmov 0.0   ;;  %vm89_vm14 = vcmask 392192   ;;  %vm887_vm15 = vcmask 1041409  }
  0x10   :  { %1002 = vmatprep.subr.msk.bf16.mxu0 %vm36_vm2, %v28_v61  ;;  %v38_v62 = vsel %vm36_vm2, %v28_v61, 0  ;;  %vm907_vm0 = vcmask 386048  }
  0x11   :  { %965 = vmatpush3.bf16.msra.mxu0 %v38_v62  ;;  %v163_v2 = vadd.s32 24, %v1173_v1 }
  0x12   :  { %978 = vmatprep.subr.bf16.mxu0 %v1018_v63 }
  0x13   :  { %544 = vrot.lane.b32.xlu1 %v541_v36, %s1055_s9  ;;  %532 = vrot.lane.b32.xlu0 %v527_v37, %s1054_s8  ;;  %v189_v4 = vand.u32 15, %v163_v2 }
  0x14   :  { %967 = vmatmul.mubr.msk.bf16.vlgmr.msra.gmra.mxu0 %vm29_vm4, %v1103_v7 }
  0x15   :  { %979 = vmatpush3.bf16.msra.mxu0 %v1018_v63  ;;  %vm215_vm10 = vcmp.lt.s32.totalorder %v189_v4, 14  ;;  %vm558_vm12 = vcmp.lt.s32.totalorder %v189_v4, 12 }
  0x16   :  { %v1181_v9 = vsel %vm215_vm10, 1.0, %v1057_v8  ;;  %v1215_v36 = vsel %vm558_vm12, 1.0, %v1057_v8 }
  0x17   :  { %542 = vrot.lane.b32.xlu0 %v539_v39, %s1055_s9 }
  0x1b   :  { %682 = vrot.lane.b32.xlu0 %v681_v41, %s1056_s12 }
  0x79   :  { %v147_v42 = vpop.permute.xlu1 %146 }
  0x7d   :  { %v134_v43 = vpop.permute.xlu0 %133  ;;  %v149_v46 = vpop.permute.xlu1 %148 }
  0x7e   :  { %v151_v44 = vsel %vm29_vm4, %v1098_v3, %v134_v43  ;;  %v161_v3 = vadd.s32 8, %v1173_v1 }
  0x7f   :  { %v156_v45 = vsel %vm154_vm6, %v151_v44, %v147_v42 }
  0x80   :  { %974 = vmatprep.mubr.msk.bf16.mxu1 %vm233_vm7, %v156_v45  ;;  %v175_v5 = vand.u32 15, %v161_v3 }
  0x81   :  { %v136_v47 = vpop.permute.xlu0 %135  ;;  %v535_v53 = vpop.permute.xlu1 %534 }
  0x82   :  { %v153_v48 = vsel %vm29_vm4, %v1103_v7, %v136_v47  ;;  %vm213_vm11 = vcmp.lt.s32.totalorder %v175_v5, 14  ;;  %vm556_vm13 = vcmp.lt.s32.totalorder %v175_v5, 12 }
  0x83   :  { %v158_v51 = vsel %vm154_vm6, %v153_v48, %v149_v46  ;;  %v1183_v11 = vsel %vm213_vm11, 1.0, %v1057_v8  ;;  %v1217_v38 = vsel %vm556_vm13, 1.0, %v1057_v8 }
  0x84   :  { %975 = vmatmul.mubr.msk.bf16.vlgmr.msra.gmra.mxu1 %vm233_vm7, %v158_v51  ;;  %v549_v59 = vsel %vm233_vm7, %v158_v51, %v535_v53 }
  0x85   :  { %985 = vmatpush3.bf16.msra.mxu1 %v588_v49  ;;  %v533_v52 = vpop.permute.xlu0 %532  ;;  %v545_v58 = vpop.permute.xlu1 %544 }
  0x86   :  { %986 = vmatprep.subr.bf16.mxu1 %v1016_v50  ;;  %v547_v55 = vsel %vm233_vm7, %v156_v45, %v533_v52  ;;  %v554_v60 = vsel %vm550_vm9, %v549_v59, %v545_v58 }
  0x89   :  { %987 = vmatpush3.bf16.msra.mxu1 %v1016_v50  ;;  %v543_v56 = vpop.permute.xlu0 %542 }
  0x8a   :  { %v552_v57 = vsel %vm550_vm9, %v547_v55, %v543_v56  ;;  %988 = vmatprep.subr.bf16.mxu1 %v1017_v54 }
  0x8b   :  { %990 = vmatprep.mubr.msk.bf16.mxu1 %vm582_vm8, %v552_v57 }
  0x8d   :  { %989 = vmatpush3.bf16.msra.mxu1 %v1017_v54 }
  0x90   :  { %991 = vmatmul.mubr.msk.bf16.vlgmr.msra.gmra.mxu1 %vm582_vm8, %v554_v60 }
 0x144   :  { %v1177_v6 = vpop.f32.mrf.mxu1 }
 0x145   :  { %v310_v16 = vmul.f32 %v1177_v6, %v1177_v6  ;;  %v297_v21 = vsel %vm154_vm6, %v1177_v6, 0.0 }
 0x146   :  { %v1179_v7 = vpop.f32.mrf.mxu1 }
 0x147   :  { %v308_v13 = vmul.f32 %v1179_v7, %v1179_v7  ;;  %v294_v17 = vsel %vm154_vm6, %v1179_v7, 0.0  ;;  %v315_v28 = vsel %vm154_vm6, %v310_v16, 0.0 }
 0x148   :  { %v977_v10 = vpop.f32.mrf.mxu1 }
 0x149   :  { %v1188_v14 = vmul.f32 %v977_v10, %v1181_v9  ;;  %v312_v22 = vsel %vm154_vm6, %v308_v13, 0.0 }
 0x14a   :  { %v278_v12 = vpop.f32.mrf.mxu1 }
 0x14b   :  { %v1191_v15 = vmul.f32 %v1183_v11, %v278_v12  ;;  %v311_v23 = vmul.f32 %v1188_v14, %v1188_v14  ;;  %v299_v29 = vsel %vm154_vm6, %v1188_v14, 0.0 }
 0x14d   :  { %v295_v18 = vsel %vm154_vm6, %v1191_v15, 0.0  ;;  %v309_v19 = vmul.f32 %v1191_v15, %v1191_v15  ;;  %v317_v33 = vsel %vm154_vm6, %v311_v23, 0.0 }
 0x14e   :  { %v296_v20 = vadd.f32 %v295_v18, %v294_v17 }
 0x14f   :  { %v313_v24 = vsel %vm154_vm6, %v309_v19, 0.0 }
 0x150   :  { %v298_v25 = vadd.f32 %v297_v21, %v296_v20  ;;  %v314_v26 = vadd.f32 %v313_v24, %v312_v22  ;;  %v1207_v27 = vpop.f32.mrf.mxu1 }
 0x151   :  { %v659_v48 = vmul.f32 %v1207_v27, %v1207_v27  ;;  %v646_v55 = vsel %vm550_vm9, %v1207_v27, 0.0 }
 0x152   :  { %v300_v30 = vadd.f32 %v299_v29, %v298_v25  ;;  %v316_v31 = vadd.f32 %v315_v28, %v314_v26  ;;  %v1212_v32 = vpop.f32.mrf.mxu1 }
 0x153   :  { %v657_v43 = vmul.f32 %v1212_v32, %v1212_v32  ;;  %v643_v49 = vsel %vm550_vm9, %v1212_v32, 0.0  ;;  %v664_v63 = vsel %vm550_vm9, %v659_v48, 0.0  ;;  %v334_v48 = vsub.s32 1, %v1173_v1 }
 0x154   :  { %v301_v34 = vrot.slane %v300_v30, 4  ;;  %v318_v35 = vadd.f32 %v317_v33, %v316_v31  ;;  %v993_v37 = vpop.f32.mrf.mxu1 }
 0x155   :  { %v1222_v44 = vmul.f32 %v993_v37, %v1215_v36  ;;  %v661_v56 = vsel %vm550_vm9, %v657_v43, 0.0 }
 0x156   :  { %v302_v39 = vadd.f32 %v301_v34, %v300_v30  ;;  %v319_v41 = vrot.slane %v318_v35, 4  ;;  %v627_v42 = vpop.f32.mrf.mxu1 }
 0x157   :  { %v1225_v45 = vmul.f32 %v1217_v38, %v627_v42  ;;  %v660_v57 = vmul.f32 %v1222_v44, %v1222_v44  ;;  %v648_v0 = vsel %vm550_vm9, %v1222_v44, 0.0 }
 0x158   :  { %v303_v46 = vrot.slane %v302_v39, 2  ;;  %v320_v47 = vadd.f32 %v319_v41, %v318_v35 }
 0x159   :  { %v644_v50 = vsel %vm550_vm9, %v1225_v45, 0.0  ;;  %v658_v51 = vmul.f32 %v1225_v45, %v1225_v45  ;;  %v666_v8 = vsel %vm550_vm9, %v660_v57, 0.0 }
 0x15a   :  { %v304_v52 = vadd.f32 %v303_v46, %v302_v39  ;;  %v321_v53 = vrot.slane %v320_v47, 2  ;;  %v645_v54 = vadd.f32 %v644_v50, %v643_v49 }
 0x15b   :  { %v662_v58 = vsel %vm550_vm9, %v658_v51, 0.0 }
 0x15c   :  { %v305_v59 = vrot.slane %v304_v52, 1  ;;  %v322_v60 = vadd.f32 %v321_v53, %v320_v47  ;;  %v647_v61 = vadd.f32 %v646_v55, %v645_v54  ;;  %v663_v62 = vadd.f32 %v662_v58, %v661_v56  ;;  %v683_v58 = vpop.permute.xlu0 %682 }
 0x15e   :  { %v306_v2 = vadd.f32 %v305_v59, %v304_v52  ;;  %v323_v3 = vrot.slane %v322_v60, 1  ;;  %v649_v4 = vadd.f32 %v648_v0, %v647_v61  ;;  %v665_v5 = vadd.f32 %v664_v63, %v663_v62 }
 0x15f   :  { %v347_v52 = vsub.s32 2, %v1173_v1  ;;  %v1254_v62 = vsub.s32 0, %v1173_v1 }
 0x160   :  { %v307_v10 = vmul.f32 0.035714287, %v306_v2  ;;  %v324_v12 = vadd.f32 %v323_v3, %v322_v60  ;;  %v667_v13 = vadd.f32 %v666_v8, %v665_v5  ;;  %v650_v16 = vrot.slane %v649_v4, 4 }
 0x162   :  { %v325_v17 = vmul.f32 0.035714287, %v324_v12  ;;  %v326_v18 = vmul.f32 %v307_v10, %v307_v10  ;;  %v668_v19 = vrot.slane %v667_v13, 4  ;;  %v651_v20 = vadd.f32 %v650_v16, %v649_v4 }
 0x164   :  { %v327_v21 = vsub.f32 %v325_v17, %v326_v18  ;;  %v669_v22 = vadd.f32 %v668_v19, %v667_v13  ;;  %v652_v23 = vrot.slane %v651_v20, 2 }
 0x166   :  { %v328_v24 = vmax.f32 %v327_v21, 0.0  ;;  %v653_v25 = vadd.f32 %v652_v23, %v651_v20  ;;  %v670_v26 = vrot.slane %v669_v22, 2  ;;  %v968_v21 = vpop.f32.mrf.mxu0 }
 0x168   :  { %v329_v28 = vadd.f32 1e-05, %v328_v24  ;;  %v654_v29 = vrot.slane %v653_v25, 1  ;;  %v671_v30 = vadd.f32 %v670_v26, %v669_v22  ;;  %v1020_v24 = vld [vmem:[%s1370_s2 + $0x14] sm:$0xff]  }
 0x16a   :  { %1021 = vrsqrt.f32 %v329_v28  ;;  %v655_v31 = vadd.f32 %v654_v29, %v653_v25  ;;  %v672_v33 = vrot.slane %v671_v30, 1  ;;  %v827_v29 = vrot.slane %v1140_v40, 3 }
 0x16c   :  { %v656_v34 = vmul.f32 0.041666668, %v655_v31  ;;  %v673_v35 = vadd.f32 %v672_v33, %v671_v30 }
 0x16e   :  { %v674_v37 = vmul.f32 0.041666668, %v673_v35  ;;  %v675_v39 = vmul.f32 %v656_v34, %v656_v34 }
 0x170   :  { %v676_v41 = vsub.f32 %v674_v37, %v675_v39 }
 0x172   :  { %v677_v42 = vmax.f32 %v676_v41, 0.0 }
 0x174   :  { %v678_v43 = vadd.f32 1e-05, %v677_v42 }
 0x176   :  { %1023 = vrsqrt.f32 %v678_v43 }
 0x177   :  { %v1022_v46 = vpop.eup %1021 }
 0x178   :  { %v331_v47 = vmul.f32 %v1022_v46, %v1140_v40 }
 0x17a   :  { %v340_v49 = vmul.f32 %v331_v47, %v307_v10  ;;  %v335_v50 = vrot.slane %v331_v47, %v334_v48 }
 0x17c   :  { %v342_v51 = vrot.slane %v340_v49, 7  ;;  %v336_v54 = vmul.f32 %v335_v50, %v1179_v7  ;;  %v337_v55 = vmul.f32 %v335_v50, %v1191_v15  ;;  %v339_v57 = vmul.f32 %v335_v50, %v1188_v14 }
 0x17d   :  { %v338_v59 = vmul.f32 %v1177_v6, %v335_v50 }
 0x17e   :  { %v344_v53 = vsub.f32 %v1140_v40, %v342_v51 }
 0x180   :  { %v348_v56 = vrot.slane %v344_v53, %v347_v52 }
 0x182   :  { %v349_v60 = vadd.f32 %v348_v56, %v336_v54  ;;  %v350_v61 = vadd.f32 %v348_v56, %v337_v55  ;;  %v352_v63 = vadd.f32 %v348_v56, %v339_v57  ;;  %v351_v2 = vadd.f32 %v348_v56, %v338_v59 }
 0x183   :  { %v1024_v0 = vpop.eup %1023 }
 0x184   :  { %v354_v3 = vmax.f32 %v350_v61, 0.0  ;;  %v685_v4 = vmul.f32 %v1024_v0, %v683_v58  ;;  %v356_v5 = vmax.f32 %v352_v63, 0.0  ;;  %v353_v7 = vmax.f32 %v349_v60, 0.0 }
 0x185   :  { %v355_v10 = vmax.f32 %v351_v2, 0.0 }
 0x186   :  { %v358_v15 = vmul.f32 %v1183_v11, %v354_v3  ;;  %v689_v8 = vrot.slane %v685_v4, %v1254_v62  ;;  %v694_v14 = vmul.f32 %v685_v4, %v656_v34  ;;  %v360_v6 = vmul.f32 %v1181_v9, %v356_v5 }
 0x188   :  { %v361_v12 = vpack.c.bf16 %v358_v15, %v353_v7  ;;  %v696_v13 = vrot.slane %v694_v14, 6  ;;  %v1260_v16 = vmul.f32 %v689_v8, %v1212_v32  ;;  %v1263_v17 = vmul.f32 %v689_v8, %v1225_v45  ;;  %v1274_v32 = vpop.f32.mrf.mxu0 }
 0x189   :  { %v362_v18 = vpack.c.bf16 %v360_v6, %v355_v10  ;;  %v1266_v19 = vmul.f32 %v1207_v27, %v689_v8  ;;  %v1269_v20 = vmul.f32 %v689_v8, %v1222_v44  ;;  %v99_v45 = vsel %vm89_vm14, %v968_v21, -inf  ;;  %v1019_v44 = vld [vmem:[%s1370_s2 + $0x1c] sm:$0xff]   ;;  %s1058_s2 = smov [#allocation2]  }
 0x18a   :  { %697 = vrot.lane.b32.xlu1 %v696_v13, %s1052_s27  ;;  %980 = vmatprep.mubr.msk.bf16.mxu0 %vm154_vm6, %v361_v12  ;;  %v969_v22 = vpop.f32.mrf.mxu0  ;;  %s915_s22 = sshll.u32 %s1058_s2, 4  ;;  %s916_s22 = int_to_ptr.vmem [resolvable:$true] %s915_s22 }
 0x18b   :  { %981 = vmatmul.mubr.msk.bf16.vlgmr.msra.gmra.mxu0 %vm154_vm6, %v362_v18  ;;  %v100_v23 = vsel %vm89_vm14, %v969_v22, -inf  ;;  %994 = vmatprep.subr.bf16.mxu0 %v1019_v44  ;;  %s1029_s23 = scalar_lea.vmem %s916_s22, 32  ;;  %p1034_p1 = scmp.lt.s32.totalorder %s916_s22, %s916_s22 }
 0x18c   :  { %v1278_v27 = vmax.f32 %v99_v45, %v100_v23  ;;  %995 = vmatpush3.bf16.msra.mxu0 %v1019_v44  ;;  %v1290_v30 = vpop.f32.mrf.mxu0  ;;  %p1030_p0 = scmp.ne.s32.totalorder %s916_s22, %s1029_s23  ;;  %p1035_p2 = scmp.lt.s32.totalorder %s1029_s23, %s1029_s23 }
 0x18d   :  { %996 = vmatprep.subr.bf16.mxu0 %v1020_v24 }
 0x18e   :  { %828 = vrot.lane.b32.xlu1 %v827_v29, %s1056_s12  ;;  %p1036_p3 = por %p1035_p2, %p1034_p1 }
 0x190   :  { %997 = vmatpush3.bf16.msra.mxu0 %v1020_v24  ;;  %p1037_p4 = pnand %p1036_p3, %p1030_p0 }
 0x1fc   :  { %v698_v25 = vpop.permute.xlu1 %697 }
 0x1fd   :  { %v700_v26 = vsub.f32 %v1140_v40, %v698_v25 }
 0x1ff   :  { %v704_v28 = vrot.slane %v700_v26, %v347_v52 }
 0x201   :  { %706 = vrot.lane.b32.xlu0 %v704_v28, %s1056_s12 }
 0x24b   :  { %v982_v31 = vpop.f32.mrf.mxu0 }
 0x24c   :  { %v440_v39 = vmul.f32 %v982_v31, %v982_v31  ;;  %v427_v47 = vsel %vm154_vm6, %v982_v31, 0.0 }
 0x24d   :  { %v409_v33 = vpop.f32.mrf.mxu0 }
 0x24e   :  { %v438_v35 = vmul.f32 %v409_v33, %v409_v33  ;;  %v424_v41 = vsel %vm154_vm6, %v409_v33, 0.0  ;;  %v445_v53 = vsel %vm154_vm6, %v440_v39, 0.0 }
 0x24f   :  { %v983_v34 = vpop.f32.mrf.mxu0 }
 0x250   :  { %v442_v48 = vsel %vm154_vm6, %v438_v35, 0.0  ;;  %v441_v49 = vmul.f32 %v983_v34, %v983_v34  ;;  %v429_v54 = vsel %vm154_vm6, %v983_v34, 0.0 }
 0x251   :  { %v1292_v37 = vpop.f32.mrf.mxu0 }
 0x252   :  { %v425_v42 = vsel %vm154_vm6, %v1292_v37, 0.0  ;;  %v439_v43 = vmul.f32 %v1292_v37, %v1292_v37  ;;  %v447_v57 = vsel %vm154_vm6, %v441_v49, 0.0 }
 0x253   :  { %v426_v46 = vadd.f32 %v425_v42, %v424_v41  ;;  %v464_v42 = vsub.s32 3, %v1173_v1 }
 0x254   :  { %v443_v50 = vsel %vm154_vm6, %v439_v43, 0.0 }
 0x255   :  { %v428_v51 = vadd.f32 %v427_v47, %v426_v46  ;;  %v444_v52 = vadd.f32 %v443_v50, %v442_v48  ;;  %v477_v48 = vsub.s32 4, %v1173_v1 }
 0x257   :  { %v430_v55 = vadd.f32 %v429_v54, %v428_v51  ;;  %v446_v56 = vadd.f32 %v445_v53, %v444_v52 }
 0x259   :  { %v431_v58 = vrot.slane %v430_v55, 4  ;;  %v448_v59 = vadd.f32 %v447_v57, %v446_v56 }
 0x25b   :  { %v432_v60 = vadd.f32 %v431_v58, %v430_v55  ;;  %v449_v61 = vrot.slane %v448_v59, 4 }
 0x25d   :  { %v433_v63 = vrot.slane %v432_v60, 2  ;;  %v450_v0 = vadd.f32 %v449_v61, %v448_v59 }
 0x25f   :  { %v434_v2 = vadd.f32 %v433_v63, %v432_v60  ;;  %v451_v3 = vrot.slane %v450_v0, 2 }
 0x261   :  { %v435_v4 = vrot.slane %v434_v2, 1  ;;  %v452_v5 = vadd.f32 %v451_v3, %v450_v0 }
 0x263   :  { %v436_v7 = vadd.f32 %v435_v4, %v434_v2  ;;  %v453_v15 = vrot.slane %v452_v5, 1 }
 0x265   :  { %v437_v8 = vmul.f32 0.035714287, %v436_v7  ;;  %v454_v14 = vadd.f32 %v453_v15, %v452_v5 }
 0x267   :  { %v455_v10 = vmul.f32 0.035714287, %v454_v14  ;;  %v456_v6 = vmul.f32 %v437_v8, %v437_v8 }
 0x269   :  { %v457_v12 = vsub.f32 %v455_v10, %v456_v6  ;;  %v91_v10 = vsel %vm89_vm14, %v1290_v30, -inf }
 0x26b   :  { %v458_v13 = vmax.f32 %v457_v12, 0.0 }
 0x26d   :  { %v459_v18 = vadd.f32 1e-05, %v458_v13 }
 0x26f   :  { %1025 = vrsqrt.f32 %v459_v18 }
 0x273   :  { %v707_v21 = vpop.permute.xlu0 %706 }
 0x274   :  { %v709_v45 = vadd.f32 %v707_v21, %v1260_v16  ;;  %v710_v22 = vadd.f32 %v707_v21, %v1263_v17  ;;  %v711_v23 = vadd.f32 %v707_v21, %v1266_v19  ;;  %v712_v44 = vadd.f32 %v707_v21, %v1269_v20 }
 0x276   :  { %v714_v24 = vmax.f32 %v710_v22, 0.0  ;;  %v716_v25 = vmax.f32 %v712_v44, 0.0  ;;  %v713_v26 = vmax.f32 %v709_v45, 0.0  ;;  %v715_v28 = vmax.f32 %v711_v23, 0.0 }
 0x277   :  { %v102_v22 = vrot.slane %v1278_v27, 4 }
 0x278   :  { %v718_v29 = vmul.f32 %v1217_v38, %v714_v24  ;;  %v720_v35 = vmul.f32 %v1215_v36, %v716_v25 }
 0x279   :  { %v103_v44 = vmax.f32 %v1278_v27, %v102_v22 }
 0x27a   :  { %v722_v39 = vpack.c.bf16 %v720_v35, %v715_v28  ;;  %v721_v41 = vpack.c.bf16 %v718_v29, %v713_v26 }
 0x27b   :  { %v104_v25 = vrot.slane %v103_v44, 2 }
 0x27c   :  { %v1026_v43 = vpop.eup %1025  ;;  %998 = vmatprep.mubr.msk.bf16.mxu0 %vm550_vm9, %v721_v41 }
 0x27d   :  { %v461_v16 = vmul.f32 %v1026_v43, %v1140_v40  ;;  %999 = vmatmul.mubr.msk.bf16.vlgmr.msra.gmra.mxu0 %vm550_vm9, %v722_v39  ;;  %v105_v26 = vmax.f32 %v103_v44, %v104_v25 }
 0x27f   :  { %v465_v17 = vrot.slane %v461_v16, %v464_v42  ;;  %v470_v19 = vmul.f32 %v461_v16, %v437_v8  ;;  %v106_v30 = vrot.slane %v105_v26, 1 }
 0x281   :  { %v466_v20 = vmul.f32 %v465_v17, %v409_v33  ;;  %v468_v46 = vmul.f32 %v982_v31, %v465_v17  ;;  %v469_v47 = vmul.f32 %v983_v34, %v465_v17  ;;  %v472_v49 = vrot.slane %v470_v19, 7 }
 0x282   :  { %v467_v51 = vmul.f32 %v465_v17, %v1292_v37  ;;  %v107_v35 = vmax.f32 %v105_v26, %v106_v30 }
 0x283   :  { %v474_v50 = vsub.f32 %v1140_v40, %v472_v49 }
 0x285   :  { %v478_v52 = vrot.slane %v474_v50, %v477_v48 }
 0x287   :  { %v479_v53 = vadd.f32 %v478_v52, %v466_v20  ;;  %v480_v54 = vadd.f32 %v478_v52, %v467_v51  ;;  %v481_v55 = vadd.f32 %v478_v52, %v468_v46  ;;  %v482_v56 = vadd.f32 %v478_v52, %v469_v47 }
 0x289   :  { %v483_v57 = vmax.f32 %v479_v53, 0.0  ;;  %v484_v58 = vmax.f32 %v480_v54, 0.0  ;;  %v485_v59 = vmax.f32 %v481_v55, 0.0  ;;  %v486_v33 = vmax.f32 %v482_v56, 0.0 }
 0x28b   :  { %v488_v31 = vmul.f32 %v1183_v11, %v484_v58  ;;  %v490_v34 = vmul.f32 %v1181_v9, %v486_v33  ;;  %v491_v60 = vsel %vm154_vm6, %v483_v57, -inf  ;;  %v500_v37 = vsel %vm154_vm6, %v485_v59, -inf }
 0x28c   :  { %v90_v9 = vsel %vm89_vm14, %v1274_v32, -inf }
 0x28d   :  { %v492_v61 = vsel %vm154_vm6, %v488_v31, -inf  ;;  %v501_v63 = vsel %vm154_vm6, %v490_v34, -inf  ;;  %v92_v21 = vmax.f32 %v90_v9, %v91_v10 }
 0x28e   :  { %v493_v0 = vmax.f32 %v491_v60, %v492_v61  ;;  %v502_v2 = vmax.f32 %v500_v37, %v501_v63 }
 0x28f   :  { %v93_v23 = vrot.slane %v92_v21, 4 }
 0x290   :  { %v494_v3 = vrot.slane %v493_v0, 4  ;;  %v503_v4 = vrot.slane %v502_v2, 4 }
 0x291   :  { %v94_v24 = vmax.f32 %v92_v21, %v93_v23 }
 0x292   :  { %v495_v5 = vmax.f32 %v493_v0, %v494_v3  ;;  %v504_v7 = vmax.f32 %v502_v2, %v503_v4 }
 0x293   :  { %v95_v32 = vrot.slane %v94_v24, 2 }
 0x294   :  { %v496_v15 = vrot.slane %v495_v5, 2  ;;  %v505_v8 = vrot.slane %v504_v7, 2 }
 0x295   :  { %v96_v28 = vmax.f32 %v94_v24, %v95_v32 }
 0x296   :  { %v497_v14 = vmax.f32 %v495_v5, %v496_v15  ;;  %v506_v11 = vmax.f32 %v504_v7, %v505_v8 }
 0x297   :  { %v97_v29 = vrot.slane %v96_v28, 1 }
 0x298   :  { %v498_v6 = vrot.slane %v497_v14, 1  ;;  %v507_v12 = vrot.slane %v506_v11, 1 }
 0x299   :  { %v98_v39 = vmax.f32 %v96_v28, %v97_v29 }
 0x29a   :  { %v499_v13 = vmax.f32 %v497_v14, %v498_v6  ;;  %v508_v18 = vmax.f32 %v506_v11, %v507_v12  ;;  %v829_v12 = vpop.permute.xlu1 %828 }
 0x29b   :  { %v1336_v41 = vsel %vm887_vm15, %v107_v35, %v98_v39 }
 0x29c   :  { %v1331_v45 = vsel %vm887_vm15, %v508_v18, %v499_v13 }
 0x33d   :  { %v1000_v42 = vpop.f32.mrf.mxu0 }
 0x33e   :  { %v806_v20 = vmul.f32 %v1000_v42, %v1000_v42  ;;  %v793_v50 = vsel %vm550_vm9, %v1000_v42, 0.0 }
 0x33f   :  { %v775_v43 = vpop.f32.mrf.mxu0 }
 0x340   :  { %v804_v17 = vmul.f32 %v775_v43, %v775_v43  ;;  %v790_v27 = vsel %vm550_vm9, %v775_v43, 0.0  ;;  %v811_v56 = vsel %vm550_vm9, %v806_v20, 0.0 }
 0x341   :  { %v1001_v16 = vpop.f32.mrf.mxu0 }
 0x342   :  { %v808_v51 = vsel %vm550_vm9, %v804_v17, 0.0  ;;  %v807_v52 = vmul.f32 %v1001_v16, %v1001_v16  ;;  %v795_v57 = vsel %vm550_vm9, %v1001_v16, 0.0 }
 0x343   :  { %v778_v19 = vpop.f32.mrf.mxu0 }
 0x344   :  { %v791_v46 = vsel %vm550_vm9, %v778_v19, 0.0  ;;  %v805_v47 = vmul.f32 %v778_v19, %v778_v19  ;;  %v813_v33 = vsel %vm550_vm9, %v807_v52, 0.0 }
 0x345   :  { %v792_v49 = vadd.f32 %v791_v46, %v790_v27 }
 0x346   :  { %v809_v53 = vsel %vm550_vm9, %v805_v47, 0.0 }
 0x347   :  { %v794_v54 = vadd.f32 %v793_v50, %v792_v49  ;;  %v810_v55 = vadd.f32 %v809_v53, %v808_v51 }
 0x349   :  { %v796_v58 = vadd.f32 %v795_v57, %v794_v54  ;;  %v812_v59 = vadd.f32 %v811_v56, %v810_v55 }
 0x34b   :  { %v797_v31 = vrot.slane %v796_v58, 4  ;;  %v814_v34 = vadd.f32 %v813_v33, %v812_v59 }
 0x34d   :  { %v798_v60 = vadd.f32 %v797_v31, %v796_v58  ;;  %v815_v61 = vrot.slane %v814_v34, 4 }
 0x34f   :  { %v816_v37 = vadd.f32 %v815_v61, %v814_v34  ;;  %v799_v63 = vrot.slane %v798_v60, 2  ;;  %v905_v61 = vrot.slane %v1140_v40, %v1254_v62 }
 0x351   :  { %v817_v0 = vrot.slane %v816_v37, 2  ;;  %v800_v2 = vadd.f32 %v799_v63, %v798_v60 }
 0x353   :  { %v818_v3 = vadd.f32 %v817_v0, %v816_v37  ;;  %v801_v4 = vrot.slane %v800_v2, 1 }
 0x355   :  { %v802_v5 = vadd.f32 %v801_v4, %v800_v2  ;;  %v819_v7 = vrot.slane %v818_v3, 1 }
 0x357   :  { %v803_v15 = vmul.f32 0.041666668, %v802_v5  ;;  %v820_v8 = vadd.f32 %v819_v7, %v818_v3 }
 0x359   :  { %v821_v14 = vmul.f32 0.041666668, %v820_v8  ;;  %v822_v11 = vmul.f32 %v803_v15, %v803_v15 }
 0x35b   :  { %v823_v9 = vsub.f32 %v821_v14, %v822_v11 }
 0x35d   :  { %v824_v10 = vmax.f32 %v823_v9, 0.0 }
 0x35f   :  { %v825_v6 = vadd.f32 1e-05, %v824_v10 }
 0x361   :  { %1027 = vrsqrt.f32 %v825_v6 }
 0x36e   :  { %v1028_v13 = vpop.eup %1027 }
 0x36f   :  { %v831_v18 = vmul.f32 %v1028_v13, %v829_v12 }
 0x371   :  { %v835_v21 = vrot.slane %v831_v18, %v1254_v62  ;;  %v840_v22 = vmul.f32 %v831_v18, %v803_v15 }
 0x373   :  { %v842_v23 = vrot.slane %v840_v22, 4  ;;  %v836_v44 = vmul.f32 %v835_v21, %v775_v43  ;;  %v837_v24 = vmul.f32 %v835_v21, %v778_v19  ;;  %v838_v25 = vmul.f32 %v1000_v42, %v835_v21 }
 0x374   :  { %v839_v32 = vmul.f32 %v1001_v16, %v835_v21 }
 0x375   :  { %843 = vrot.lane.b32.xlu0 %v842_v23, %s1052_s27 }
 0x3e7   :  { %v844_v26 = vpop.permute.xlu0 %843 }
 0x3e8   :  { %v846_v28 = vsub.f32 %v1140_v40, %v844_v26 }
 0x3ea   :  { %v850_v30 = vrot.slane %v846_v28, %v477_v48 }
 0x3ec   :  { %852 = vrot.lane.b32.xlu1 %v850_v30, %s1056_s12 }
 0x45e   :  { %v853_v29 = vpop.permute.xlu1 %852 }
 0x45f   :  { %v855_v35 = vadd.f32 %v853_v29, %v836_v44  ;;  %v856_v39 = vadd.f32 %v853_v29, %v837_v24  ;;  %v857_v17 = vadd.f32 %v853_v29, %v838_v25  ;;  %v858_v20 = vadd.f32 %v853_v29, %v839_v32 }
 0x461   :  { %v859_v27 = vmax.f32 %v855_v35, 0.0  ;;  %v860_v43 = vmax.f32 %v856_v39, 0.0  ;;  %v861_v19 = vmax.f32 %v857_v17, 0.0  ;;  %v862_v42 = vmax.f32 %v858_v20, 0.0 }
 0x463   :  { %v864_v16 = vmul.f32 %v1217_v38, %v860_v43  ;;  %v866_v46 = vmul.f32 %v1215_v36, %v862_v42  ;;  %v867_v47 = vsel %vm550_vm9, %v859_v27, -inf  ;;  %v876_v48 = vsel %vm550_vm9, %v861_v19, -inf }
 0x465   :  { %v868_v1 = vsel %vm550_vm9, %v864_v16, -inf  ;;  %v877_v49 = vsel %vm550_vm9, %v866_v46, -inf }
 0x466   :  { %v869_v50 = vmax.f32 %v867_v47, %v868_v1  ;;  %v878_v51 = vmax.f32 %v876_v48, %v877_v49 }
 0x468   :  { %v870_v52 = vrot.slane %v869_v50, 4  ;;  %v879_v53 = vrot.slane %v878_v51, 4 }
 0x46a   :  { %v871_v54 = vmax.f32 %v869_v50, %v870_v52  ;;  %v880_v55 = vmax.f32 %v878_v51, %v879_v53 }
 0x46c   :  { %v872_v56 = vrot.slane %v871_v54, 2  ;;  %v881_v57 = vrot.slane %v880_v55, 2 }
 0x46e   :  { %v873_v58 = vmax.f32 %v871_v54, %v872_v56  ;;  %v882_v38 = vmax.f32 %v880_v55, %v881_v57 }
 0x470   :  { %v874_v59 = vrot.slane %v873_v58, 1  ;;  %v883_v36 = vrot.slane %v882_v38, 1 }
 0x472   :  { %v875_v33 = vmax.f32 %v873_v58, %v874_v59  ;;  %v884_v31 = vmax.f32 %v882_v38, %v883_v36 }
 0x474   :  { %v892_v34 = vsel %vm887_vm15, %v884_v31, %v875_v33 }
 0x475   :  { %893 = vrot.lane.b32.xlu0 %v892_v34, %s1052_s27 }
 0x4e7   :  { %v894_v60 = vpop.permute.xlu0 %893 }
 0x4e8   :  { %v896_v37 = vsel %vm154_vm6, %v1331_v45, %v894_v60 }
 0x4e9   :  { %v901_v63 = vadd.f32 %v1336_v41, %v896_v37 }
 0x4eb   :  { %v906_v0 = vadd.f32 %v905_v61, %v901_v63 }
 0x4ed   :  { %908 = vst.msk [vmem:[#allocation2] sm:$0x3] %vm907_vm0, %v906_v0 }
 0x4ee   :  { %1040 = shalt.err (!%p1037_p4)
}
 0x4ef   :  { %918 = dma.vmem_to_hbm [thread:$0]  %s916_s22, 32, %s1373_s5, [#allocation3]  }
 0x4f0   :  { %1049 = dma.done.wait [#allocation3], 32  }
 0x4f1   :  { %1050 = vsyncadd [#allocation3], 4294967264 }
 0x4f2   :  { %922 = vsyncpa [#allocation3], 1 }

</bundles_post_ra>
